<compile_context>
chip_gen: v5e
topology: v5e:2x2
jax: 0.10.0
libtpu: 0.0.40
codegen_flags: <defaults>
</compile_context>

<pallas_src>
import functools

import jax
import jax.numpy as jnp
from jax import lax
from jax.experimental import pallas as pl
from jax.experimental.pallas import tpu as pltpu

_LANES = 128
_BOXES_PER_ROW = _LANES // 4          # 32 boxes per 128-lane row
_MAX_ROWS_PER_TILE = 1024             # 1024x128 f32 = 512 KiB per stream


def _round_up(x, m):
    return (x + m - 1) // m * m


def _pairwise_area(x):
    """x: (rows, 128) slab; each box = 4 consecutive lanes (l, t, r, b).

    Returns a slab whose *valid* lane of every 4-lane group holds
    (x_l + x_r) * (x_t + x_b); the other 3 lanes hold garbage.  The valid
    lane offset (0 or 3) depends only on the rotation direction of
    pltpu.roll and is detected by _valid_offset_mask, so either convention
    gives the right answer.
    """
    s = x + pltpu.roll(x, shift=126, axis=1)    # pair sums (l+r, t+b)
    return s * pltpu.roll(s, shift=127, axis=1)  # width * height


def _valid_offset_mask(rows):
    """(rows, 128) bool mask: True on the lane of each 4-lane group where
    _pairwise_area leaves the valid per-box result (roll-direction probe)."""
    lane = lax.broadcasted_iota(jnp.int32, (rows, _LANES), 1)
    pat = lane & 3
    probe = (lax.broadcasted_iota(jnp.int32, (1, _LANES), 1) & 3).astype(jnp.float32)
    r2 = pltpu.roll(pltpu.roll(probe, shift=126, axis=1), shift=127, axis=1)
    # jnp.roll-like convention -> valid offset 0 (r2 == 3 there);
    # opposite convention        -> valid offset 3 (r2 == 0 there).
    return ((pat == 0) & (r2 == 3.0)) | ((pat == 3) & (r2 == 0.0))


def _tile_loss_and_mask(p, t, grid_idx, n_boxes, iou_type):
    """Per-box loss (on the valid lane of each group) and validity mask."""
    rows = p.shape[0]

    mins = jnp.minimum(p, t)
    maxs = jnp.maximum(p, t)

    insect = _pairwise_area(mins)
    pred_area = _pairwise_area(p)
    target_area = _pairwise_area(t)
    max_areas = _pairwise_area(maxs) + 1e-7

    areas_union = target_area + pred_area - insect
    ious = (insect + 1.0) * pl.reciprocal(areas_union + 1.0, approx=True)
    gious = ious - (max_areas - areas_union) * pl.reciprocal(max_areas, approx=True)

    if iou_type == 'iou':
        loss = -jnp.log(ious)
    elif iou_type == 'giou':
        loss = 1.0 - gious
    elif iou_type == 'linear_iou':
        loss = 1.0 - ious
    else:
        raise ValueError(f"unknown iou_type: {iou_type}")

    lane = lax.broadcasted_iota(jnp.int32, (rows, _LANES), 1)
    row = lax.broadcasted_iota(jnp.int32, (rows, _LANES), 0)
    box_idx = (grid_idx * rows + row) * _BOXES_PER_ROW + (lane >> 2)
    valid = _valid_offset_mask(rows) & (box_idx < n_boxes)
    return loss, valid


def _iou_loss_kernel_unweighted(p_ref, t_ref, out_ref, acc_l, *, iou_type, n_boxes):
    g = pl.program_id(0)

    @pl.when(g == 0)
    def _():
        acc_l[...] = jnp.zeros_like(acc_l)

    loss, valid = _tile_loss_and_mask(p_ref[...], t_ref[...], g, n_boxes, iou_type)
    zero = jnp.zeros_like(loss)
    acc_l[...] += jnp.sum(jnp.where(valid, loss, zero), axis=0, keepdims=True)

    @pl.when(g == pl.num_programs(0) - 1)
    def _():
        out_ref[...] = jnp.broadcast_to(jnp.sum(acc_l[...]), out_ref.shape)


def _iou_loss_kernel_weighted(p_ref, t_ref, w_ref, out_ref, acc_l, acc_lw, acc_w,
                              *, iou_type, n_boxes):
    g = pl.program_id(0)

    @pl.when(g == 0)
    def _():
        acc_l[...] = jnp.zeros_like(acc_l)
        acc_lw[...] = jnp.zeros_like(acc_lw)
        acc_w[...] = jnp.zeros_like(acc_w)

    w = w_ref[...]
    loss, valid = _tile_loss_and_mask(p_ref[...], t_ref[...], g, n_boxes, iou_type)
    zero = jnp.zeros_like(loss)
    acc_l[...] += jnp.sum(jnp.where(valid, loss, zero), axis=0, keepdims=True)
    acc_lw[...] += jnp.sum(jnp.where(valid, loss * w, zero), axis=0, keepdims=True)
    acc_w[...] += jnp.sum(jnp.where(valid, w, zero), axis=0, keepdims=True)

    @pl.when(g == pl.num_programs(0) - 1)
    def _():
        wsum = jnp.sum(acc_w[...])
        total = jnp.where(wsum > 0.0, jnp.sum(acc_lw[...]), jnp.sum(acc_l[...]))
        out_ref[...] = jnp.broadcast_to(total, out_ref.shape)


def iou_loss(prediction, targets, weights=None, iou_type='giou',
             max_rows_per_tile=_MAX_ROWS_PER_TILE):
    """prediction, targets: (N, 4) [l, t, r, b]; weights: (N,) or None.
    Returns the scalar (weighted) loss sum, matching the PyTorch module."""
    if iou_type not in ('iou', 'giou', 'linear_iou'):
        raise ValueError(f"unknown iou_type: {iou_type}")
    n = prediction.shape[0]
    assert n > 0 and prediction.shape == (n, 4) and tuple(targets.shape) == (n, 4)
    assert max_rows_per_tile % 8 == 0

    p = jnp.asarray(prediction, jnp.float32)
    t = jnp.asarray(targets, jnp.float32)

    n_pad = _round_up(n, _BOXES_PER_ROW)
    pad = n_pad - n
    if pad:  # only copies when N is not a multiple of 32
        p = jnp.pad(p, ((0, pad), (0, 0)))
        t = jnp.pad(t, ((0, pad), (0, 0)))

    rows = n_pad // _BOXES_PER_ROW
    # Free reshape (row-major bitcast): box i -> lanes 4*(i%32).. of row i//32.
    p2 = p.reshape(rows, _LANES)
    t2 = t.reshape(rows, _LANES)

    tile_rows = rows if rows <= max_rows_per_tile else max_rows_per_tile
    grid = (pl.cdiv(rows, tile_rows),)

    box_spec = pl.BlockSpec((tile_rows, _LANES), lambda g: (g, 0))
    out_spec = pl.BlockSpec((1, _LANES), lambda g: (0, 0))
    params = pltpu.CompilerParams(
        dimension_semantics=("arbitrary",),
        vmem_limit_bytes=32 * 1024 * 1024,
    )
    # TODO(synk): on v7x, split the box axis over the two TensorCores with a
    # leading parallel grid axis emitting per-core partial sums.

    if weights is None:
        kernel = functools.partial(_iou_loss_kernel_unweighted,
                                   iou_type=iou_type, n_boxes=n)
        out = pl.pallas_call(
            kernel,
            out_shape=jax.ShapeDtypeStruct((1, _LANES), jnp.float32),
            grid=grid,
            in_specs=[box_spec, box_spec],
            out_specs=out_spec,
            scratch_shapes=[pltpu.VMEM((1, _LANES), jnp.float32)],
            compiler_params=params,
        )(p2, t2)
    else:
        w = jnp.asarray(weights, jnp.float32).reshape(n)
        if pad:
            w = jnp.pad(w, (0, pad))
        # Put each box's weight on lane offsets 0 AND 3 of its 4-lane group so
        # it lines up with the valid lane for either roll direction.
        wcol = w[:, None]
        w2 = jnp.concatenate(
            [wcol, jnp.zeros((n_pad, 2), jnp.float32), wcol], axis=1
        ).reshape(rows, _LANES)
        kernel = functools.partial(_iou_loss_kernel_weighted,
                                   iou_type=iou_type, n_boxes=n)
        out = pl.pallas_call(
            kernel,
            out_shape=jax.ShapeDtypeStruct((1, _LANES), jnp.float32),
            grid=grid,
            in_specs=[box_spec, box_spec, box_spec],
            out_specs=out_spec,
            scratch_shapes=[pltpu.VMEM((1, _LANES), jnp.float32),
                            pltpu.VMEM((1, _LANES), jnp.float32),
                            pltpu.VMEM((1, _LANES), jnp.float32)],
            compiler_params=params,
        )(p2, t2, w2)
    return out[0, 0]


def _iou_loss_ref(prediction, targets, weights=None, iou_type='giou'):
    """Pure-JAX reference mirroring the PyTorch forward."""
    p = jnp.asarray(prediction, jnp.float32)
    t = jnp.asarray(targets, jnp.float32)
    min_w = jnp.minimum(p[:, 0], t[:, 0]) + jnp.minimum(p[:, 2], t[:, 2])
    min_h = jnp.minimum(p[:, 1], t[:, 1]) + jnp.minimum(p[:, 3], t[:, 3])
    insect = min_w * min_h
    pred_area = (p[:, 0] + p[:, 2]) * (p[:, 1] + p[:, 3])
    target_area = (t[:, 0] + t[:, 2]) * (t[:, 1] + t[:, 3])
    areas_union = target_area + pred_area - insect
    ious = (insect + 1.0) / (areas_union + 1.0)
    max_w = jnp.maximum(p[:, 0], t[:, 0]) + jnp.maximum(p[:, 2], t[:, 2])
    max_h = jnp.maximum(p[:, 1], t[:, 1]) + jnp.maximum(p[:, 3], t[:, 3])
    max_areas = max_w * max_h + 1e-07
    gious = ious - (max_areas - areas_union) / max_areas
    if iou_type == 'iou':
        loss = -jnp.log(ious)
    elif iou_type == 'giou':
        loss = 1.0 - gious
    else:
        loss = 1.0 - ious
    if weights is not None and float(jnp.sum(weights)) > 0:
        return jnp.sum(loss * jnp.asarray(weights, jnp.float32))
    return jnp.sum(loss)


if __name__ == "__main__":
    key = jax.random.PRNGKey(0)
    k1, k2, k3 = jax.random.split(key, 3)

    N = 256  # multiple of 32 -> pure reshape (zero-copy) input path
    prediction = jax.random.uniform(k1, (N, 4), jnp.float32, 0.0, 10.0)
    targets = jax.random.uniform(k2, (N, 4), jnp.float32, 0.0, 10.0)
    weights = jax.random.uniform(k3, (N,), jnp.float32, 0.0, 1.0)

    checks = []
    checks.append((iou_loss(prediction, targets, weights, 'giou'),
                   _iou_loss_ref(prediction, targets, weights, 'giou')))
    checks.append((iou_loss(prediction, targets, None, 'giou'),
                   _iou_loss_ref(prediction, targets, None, 'giou')))
    checks.append((iou_loss(prediction, targets, weights, 'iou'),
                   _iou_loss_ref(prediction, targets, weights, 'iou')))

    # Ragged N (padding + tail masking) and a multi-step grid (accumulators).
    N2 = 1000
    kk1, kk2, kk3 = jax.random.split(jax.random.PRNGKey(1), 3)
    pred2 = jax.random.uniform(kk1, (N2, 4), jnp.float32, 0.0, 10.0)
    tgt2 = jax.random.uniform(kk2, (N2, 4), jnp.float32, 0.0, 10.0)
    w2 = jax.random.uniform(kk3, (N2,), jnp.float32, 0.0, 1.0)
    checks.append((iou_loss(pred2, tgt2, w2, 'linear_iou', max_rows_per_tile=8),
                   _iou_loss_ref(pred2, tgt2, w2, 'linear_iou')))

    jax.block_until_ready([c[0] for c in checks])
    for got, want in checks:
        # approx reciprocal -> slightly looser tolerance than exact divide
        assert jnp.allclose(got, want, rtol=5e-3, atol=5e-2), (got, want)

    print("KERNEL_OK")
</pallas_src>

<mosaic_0001>
module attributes {stable_mosaic.version = 11 : i64} {
  func.func @_iou_loss_kernel_weighted(%arg0: i32, %arg1: memref<8x128xf32, #tpu.memory_space<vmem>>, %arg2: memref<8x128xf32, #tpu.memory_space<vmem>>, %arg3: memref<8x128xf32, #tpu.memory_space<vmem>>, %arg4: memref<1x128xf32, #tpu.memory_space<vmem>>, %arg5: memref<1x128xf32, #tpu.memory_space<vmem>>, %arg6: memref<1x128xf32, #tpu.memory_space<vmem>>, %arg7: memref<1x128xf32, #tpu.memory_space<vmem>>) attributes {dimension_semantics = [#tpu.dimension_semantics<arbitrary>], iteration_bounds = array<i64: 1>, scalar_prefetch = 0 : i64, scratch_operands = 3 : i64, tpu.core_type = #tpu.core_type<tc>, window_params = [{transform_indices = @transform_0, window_bounds = array<i64: 8, 128>}, {transform_indices = @transform_1, window_bounds = array<i64: 8, 128>}, {transform_indices = @transform_2, window_bounds = array<i64: 8, 128>}, {pipeline_mode = #tpu.pipeline_mode<synchronous>, transform_indices = @transform_3, window_bounds = array<i64: 1, 128>}]} {
    %c0_i32 = arith.constant 0 : i32
    %0 = arith.cmpi eq, %arg0, %c0_i32 : i32
    %1 = arith.extui %0 : i1 to i32
    %c0_i32_0 = arith.constant 0 : i32
    %2 = arith.cmpi ne, %1, %c0_i32_0 : i32
    scf.if %2 {
      %cst_40 = arith.constant 0.000000e+00 : f32
      %98 = vector.broadcast %cst_40 : f32 to vector<1x128xf32>
      %c0_41 = arith.constant 0 : index
      %c0_42 = arith.constant 0 : index
      %99 = vector.load %arg5[%c0_41, %c0_42] : memref<1x128xf32, #tpu.memory_space<vmem>>, vector<1x128xf32>
      tpu.vector_store %arg5[%c0_41, %c0_42], %98 {strides = array<i32>} : memref<1x128xf32, #tpu.memory_space<vmem>>, vector<1x128xf32>,
      %cst_43 = arith.constant 0.000000e+00 : f32
      %100 = vector.broadcast %cst_43 : f32 to vector<1x128xf32>
      %c0_44 = arith.constant 0 : index
      %c0_45 = arith.constant 0 : index
      %101 = vector.load %arg6[%c0_44, %c0_45] : memref<1x128xf32, #tpu.memory_space<vmem>>, vector<1x128xf32>
      tpu.vector_store %arg6[%c0_44, %c0_45], %100 {strides = array<i32>} : memref<1x128xf32, #tpu.memory_space<vmem>>, vector<1x128xf32>,
      %cst_46 = arith.constant 0.000000e+00 : f32
      %102 = vector.broadcast %cst_46 : f32 to vector<1x128xf32>
      %c0_47 = arith.constant 0 : index
      %c0_48 = arith.constant 0 : index
      %103 = vector.load %arg7[%c0_47, %c0_48] : memref<1x128xf32, #tpu.memory_space<vmem>>, vector<1x128xf32>
      tpu.vector_store %arg7[%c0_47, %c0_48], %102 {strides = array<i32>} : memref<1x128xf32, #tpu.memory_space<vmem>>, vector<1x128xf32>,
    } else {
    }
    %c0 = arith.constant 0 : index
    %c0_1 = arith.constant 0 : index
    %3 = vector.load %arg3[%c0, %c0_1] : memref<8x128xf32, #tpu.memory_space<vmem>>, vector<8x128xf32>
    %c0_2 = arith.constant 0 : index
    %c0_3 = arith.constant 0 : index
    %4 = vector.load %arg1[%c0_2, %c0_3] : memref<8x128xf32, #tpu.memory_space<vmem>>, vector<8x128xf32>
    %c0_4 = arith.constant 0 : index
    %c0_5 = arith.constant 0 : index
    %5 = vector.load %arg2[%c0_4, %c0_5] : memref<8x128xf32, #tpu.memory_space<vmem>>, vector<8x128xf32>
    %6 = arith.minimumf %4, %5 : vector<8x128xf32>
    %7 = arith.maximumf %4, %5 : vector<8x128xf32>
    %c126_i32 = arith.constant 126 : i32
    %8 = tpu.dynamic_rotate %6 by %c126_i32 dim 1 : vector<8x128xf32>, i32 -> vector<8x128xf32>
    %9 = arith.addf %6, %8 : vector<8x128xf32>
    %c127_i32 = arith.constant 127 : i32
    %10 = tpu.dynamic_rotate %9 by %c127_i32 dim 1 : vector<8x128xf32>, i32 -> vector<8x128xf32>
    %11 = arith.mulf %9, %10 : vector<8x128xf32>
    %c126_i32_6 = arith.constant 126 : i32
    %12 = tpu.dynamic_rotate %4 by %c126_i32_6 dim 1 : vector<8x128xf32>, i32 -> vector<8x128xf32>
    %13 = arith.addf %4, %12 : vector<8x128xf32>
    %c127_i32_7 = arith.constant 127 : i32
    %14 = tpu.dynamic_rotate %13 by %c127_i32_7 dim 1 : vector<8x128xf32>, i32 -> vector<8x128xf32>
    %15 = arith.mulf %13, %14 : vector<8x128xf32>
    %c126_i32_8 = arith.constant 126 : i32
    %16 = tpu.dynamic_rotate %5 by %c126_i32_8 dim 1 : vector<8x128xf32>, i32 -> vector<8x128xf32>
    %17 = arith.addf %5, %16 : vector<8x128xf32>
    %c127_i32_9 = arith.constant 127 : i32
    %18 = tpu.dynamic_rotate %17 by %c127_i32_9 dim 1 : vector<8x128xf32>, i32 -> vector<8x128xf32>
    %19 = arith.mulf %17, %18 : vector<8x128xf32>
    %c126_i32_10 = arith.constant 126 : i32
    %20 = tpu.dynamic_rotate %7 by %c126_i32_10 dim 1 : vector<8x128xf32>, i32 -> vector<8x128xf32>
    %21 = arith.addf %7, %20 : vector<8x128xf32>
    %c127_i32_11 = arith.constant 127 : i32
    %22 = tpu.dynamic_rotate %21 by %c127_i32_11 dim 1 : vector<8x128xf32>, i32 -> vector<8x128xf32>
    %23 = arith.mulf %21, %22 : vector<8x128xf32>
    %cst = arith.constant 1.000000e-07 : f32
    %24 = vector.broadcast %cst : f32 to vector<8x128xf32>
    %25 = arith.addf %23, %24 : vector<8x128xf32>
    %26 = arith.addf %19, %15 : vector<8x128xf32>
    %27 = arith.subf %26, %11 : vector<8x128xf32>
    %cst_12 = arith.constant 1.000000e+00 : f32
    %28 = vector.broadcast %cst_12 : f32 to vector<8x128xf32>
    %29 = arith.addf %11, %28 : vector<8x128xf32>
    %cst_13 = arith.constant 1.000000e+00 : f32
    %30 = vector.broadcast %cst_13 : f32 to vector<8x128xf32>
    %31 = arith.addf %27, %30 : vector<8x128xf32>
    %32 = tpu.reciprocal %31 {approx = true} : vector<8x128xf32> -> vector<8x128xf32>
    %33 = arith.mulf %29, %32 : vector<8x128xf32>
    %34 = arith.subf %25, %27 : vector<8x128xf32>
    %35 = tpu.reciprocal %25 {approx = true} : vector<8x128xf32> -> vector<8x128xf32>
    %36 = arith.mulf %34, %35 : vector<8x128xf32>
    %37 = arith.subf %33, %36 : vector<8x128xf32>
    %cst_14 = arith.constant 1.000000e+00 : f32
    %38 = vector.broadcast %cst_14 : f32 to vector<8x128xf32>
    %39 = arith.subf %38, %37 : vector<8x128xf32>
    %40 = tpu.iota {dimensions = array<i32: 1>} : vector<8x128xi32>
    %41 = tpu.iota {dimensions = array<i32: 0>} : vector<8x128xi32>
    %c8_i32 = arith.constant 8 : i32
    %42 = arith.muli %arg0, %c8_i32 : i32
    %43 = vector.broadcast %42 : i32 to vector<8x128xi32>
    %44 = arith.addi %43, %41 : vector<8x128xi32>
    %c32_i32 = arith.constant 32 : i32
    %45 = vector.broadcast %c32_i32 : i32 to vector<8x128xi32>
    %46 = arith.muli %44, %45 : vector<8x128xi32>
    %c2_i32 = arith.constant 2 : i32
    %47 = vector.broadcast %c2_i32 : i32 to vector<8x128xi32>
    %48 = arith.shrsi %40, %47 : vector<8x128xi32>
    %49 = arith.addi %46, %48 : vector<8x128xi32>
    %50 = tpu.iota {dimensions = array<i32: 1>} : vector<8x128xi32>
    %c3_i32 = arith.constant 3 : i32
    %51 = vector.broadcast %c3_i32 : i32 to vector<8x128xi32>
    %52 = arith.andi %50, %51 : vector<8x128xi32>
    %53 = tpu.iota {dimensions = array<i32: 1>} : vector<1x128xi32>
    %c3_i32_15 = arith.constant 3 : i32
    %54 = vector.broadcast %c3_i32_15 : i32 to vector<1x128xi32>
    %55 = arith.andi %53, %54 : vector<1x128xi32>
    %56 = arith.sitofp %55 : vector<1x128xi32> to vector<1x128xf32>
    %c126_i32_16 = arith.constant 126 : i32
    %57 = tpu.dynamic_rotate %56 by %c126_i32_16 dim 1 : vector<1x128xf32>, i32 -> vector<1x128xf32>
    %c127_i32_17 = arith.constant 127 : i32
    %58 = tpu.dynamic_rotate %57 by %c127_i32_17 dim 1 : vector<1x128xf32>, i32 -> vector<1x128xf32>
    %c0_i32_18 = arith.constant 0 : i32
    %59 = vector.broadcast %c0_i32_18 : i32 to vector<8x128xi32>
    %60 = arith.cmpi eq, %52, %59 : vector<8x128xi32>
    %cst_19 = arith.constant 3.000000e+00 : f32
    %61 = vector.broadcast %cst_19 : f32 to vector<1x128xf32>
    %62 = arith.cmpf oeq, %58, %61 : vector<1x128xf32>
    %63 = vector.broadcast %62 : vector<1x128xi1> to vector<8x128xi1>
    %64 = arith.andi %60, %63 : vector<8x128xi1>
    %c3_i32_20 = arith.constant 3 : i32
    %65 = vector.broadcast %c3_i32_20 : i32 to vector<8x128xi32>
    %66 = arith.cmpi eq, %52, %65 : vector<8x128xi32>
    %cst_21 = arith.constant 0.000000e+00 : f32
    %67 = vector.broadcast %cst_21 : f32 to vector<1x128xf32>
    %68 = arith.cmpf oeq, %58, %67 : vector<1x128xf32>
    %69 = vector.broadcast %68 : vector<1x128xi1> to vector<8x128xi1>
    %70 = arith.andi %66, %69 : vector<8x128xi1>
    %71 = arith.ori %64, %70 : vector<8x128xi1>
    %c256_i32 = arith.constant 256 : i32
    %72 = vector.broadcast %c256_i32 : i32 to vector<8x128xi32>
    %73 = arith.cmpi slt, %49, %72 : vector<8x128xi32>
    %74 = arith.andi %71, %73 : vector<8x128xi1>
    %cst_22 = arith.constant 0.000000e+00 : f32
    %75 = vector.broadcast %cst_22 : f32 to vector<8x128xf32>
    %c0_23 = arith.constant 0 : index
    %c0_24 = arith.constant 0 : index
    %76 = vector.load %arg5[%c0_23, %c0_24] : memref<1x128xf32, #tpu.memory_space<vmem>>, vector<1x128xf32>
    %77 = arith.select %74, %39, %75 : vector<8x128xi1>, vector<8x128xf32>
    %cst_25 = arith.constant dense<0.000000e+00> : vector<128xf32>
    %78 = vector.multi_reduction <add>, %77, %cst_25 [0] : vector<8x128xf32> to vector<128xf32>
    %79 = vector.shape_cast %78 : vector<128xf32> to vector<1x128xf32>
    %80 = arith.addf %76, %79 : vector<1x128xf32>
    %c0_26 = arith.constant 0 : index
    %c0_27 = arith.constant 0 : index
    %81 = vector.load %arg5[%c0_26, %c0_27] : memref<1x128xf32, #tpu.memory_space<vmem>>, vector<1x128xf32>
    tpu.vector_store %arg5[%c0_26, %c0_27], %80 {strides = array<i32>} : memref<1x128xf32, #tpu.memory_space<vmem>>, vector<1x128xf32>,
    %c0_28 = arith.constant 0 : index
    %c0_29 = arith.constant 0 : index
    %82 = vector.load %arg6[%c0_28, %c0_29] : memref<1x128xf32, #tpu.memory_space<vmem>>, vector<1x128xf32>
    %83 = arith.mulf %39, %3 : vector<8x128xf32>
    %84 = arith.select %74, %83, %75 : vector<8x128xi1>, vector<8x128xf32>
    %cst_30 = arith.constant dense<0.000000e+00> : vector<128xf32>
    %85 = vector.multi_reduction <add>, %84, %cst_30 [0] : vector<8x128xf32> to vector<128xf32>
    %86 = vector.shape_cast %85 : vector<128xf32> to vector<1x128xf32>
    %87 = arith.addf %82, %86 : vector<1x128xf32>
    %c0_31 = arith.constant 0 : index
    %c0_32 = arith.constant 0 : index
    %88 = vector.load %arg6[%c0_31, %c0_32] : memref<1x128xf32, #tpu.memory_space<vmem>>, vector<1x128xf32>
    tpu.vector_store %arg6[%c0_31, %c0_32], %87 {strides = array<i32>} : memref<1x128xf32, #tpu.memory_space<vmem>>, vector<1x128xf32>,
    %c0_33 = arith.constant 0 : index
    %c0_34 = arith.constant 0 : index
    %89 = vector.load %arg7[%c0_33, %c0_34] : memref<1x128xf32, #tpu.memory_space<vmem>>, vector<1x128xf32>
    %90 = arith.select %74, %3, %75 : vector<8x128xi1>, vector<8x128xf32>
    %cst_35 = arith.constant dense<0.000000e+00> : vector<128xf32>
    %91 = vector.multi_reduction <add>, %90, %cst_35 [0] : vector<8x128xf32> to vector<128xf32>
    %92 = vector.shape_cast %91 : vector<128xf32> to vector<1x128xf32>
    %93 = arith.addf %89, %92 : vector<1x128xf32>
    %c0_36 = arith.constant 0 : index
    %c0_37 = arith.constant 0 : index
    %94 = vector.load %arg7[%c0_36, %c0_37] : memref<1x128xf32, #tpu.memory_space<vmem>>, vector<1x128xf32>
    tpu.vector_store %arg7[%c0_36, %c0_37], %93 {strides = array<i32>} : memref<1x128xf32, #tpu.memory_space<vmem>>, vector<1x128xf32>,
    %c0_i32_38 = arith.constant 0 : i32
    %95 = arith.cmpi eq, %arg0, %c0_i32_38 : i32
    %96 = arith.extui %95 : i1 to i32
    %c0_i32_39 = arith.constant 0 : i32
    %97 = arith.cmpi ne, %96, %c0_i32_39 : i32
    scf.if %97 {
      %c0_40 = arith.constant 0 : index
      %c0_41 = arith.constant 0 : index
      %98 = vector.load %arg7[%c0_40, %c0_41] : memref<1x128xf32, #tpu.memory_space<vmem>>, vector<1x128xf32>
      %99 = vector.shape_cast %98 : vector<1x128xf32> to vector<1x1x128xf32>
      %cst_42 = arith.constant dense<0.000000e+00> : vector<1xf32>
      %100 = vector.multi_reduction <add>, %99, %cst_42 [1, 2] : vector<1x1x128xf32> to vector<1xf32>
      %101 = vector.shape_cast %100 : vector<1xf32> to vector<1x1x1xf32>
      %102 = vector.extract %101[0, 0, 0] : f32 from vector<1x1x1xf32>
      %cst_43 = arith.constant 0.000000e+00 : f32
      %103 = arith.cmpf ogt, %102, %cst_43 : f32
      %c0_44 = arith.constant 0 : index
      %c0_45 = arith.constant 0 : index
      %104 = vector.load %arg6[%c0_44, %c0_45] : memref<1x128xf32, #tpu.memory_space<vmem>>, vector<1x128xf32>
      %105 = vector.shape_cast %104 : vector<1x128xf32> to vector<1x1x128xf32>
      %cst_46 = arith.constant dense<0.000000e+00> : vector<1xf32>
      %106 = vector.multi_reduction <add>, %105, %cst_46 [1, 2] : vector<1x1x128xf32> to vector<1xf32>
      %107 = vector.shape_cast %106 : vector<1xf32> to vector<1x1x1xf32>
      %108 = vector.extract %107[0, 0, 0] : f32 from vector<1x1x1xf32>
      %c0_47 = arith.constant 0 : index
      %c0_48 = arith.constant 0 : index
      %109 = vector.load %arg5[%c0_47, %c0_48] : memref<1x128xf32, #tpu.memory_space<vmem>>, vector<1x128xf32>
      %110 = vector.shape_cast %109 : vector<1x128xf32> to vector<1x1x128xf32>
      %cst_49 = arith.constant dense<0.000000e+00> : vector<1xf32>
      %111 = vector.multi_reduction <add>, %110, %cst_49 [1, 2] : vector<1x1x128xf32> to vector<1xf32>
      %112 = vector.shape_cast %111 : vector<1xf32> to vector<1x1x1xf32>
      %113 = vector.extract %112[0, 0, 0] : f32 from vector<1x1x1xf32>
      %114 = arith.select %103, %108, %113 : f32
      %115 = vector.broadcast %114 : f32 to vector<1x128xf32>
      %c0_50 = arith.constant 0 : index
      %c0_51 = arith.constant 0 : index
      %116 = vector.load %arg4[%c0_50, %c0_51] : memref<1x128xf32, #tpu.memory_space<vmem>>, vector<1x128xf32>
      tpu.vector_store %arg4[%c0_50, %c0_51], %115 {strides = array<i32>} : memref<1x128xf32, #tpu.memory_space<vmem>>, vector<1x128xf32>,
    } else {
    }
    return
  }
  func.func @transform_0(%arg0: i32) -> (i32, i32) {
    %c0_i32 = arith.constant 0 : i32
    %c0_i32_0 = arith.constant 0 : i32
    return %arg0, %c0_i32 : i32, i32
  }
  func.func @transform_1(%arg0: i32) -> (i32, i32) {
    %c0_i32 = arith.constant 0 : i32
    %c0_i32_0 = arith.constant 0 : i32
    return %arg0, %c0_i32 : i32, i32
  }
  func.func @transform_2(%arg0: i32) -> (i32, i32) {
    %c0_i32 = arith.constant 0 : i32
    %c0_i32_0 = arith.constant 0 : i32
    return %arg0, %c0_i32 : i32, i32
  }
  func.func @transform_3(%arg0: i32) -> (i32, i32) {
    %c0_i32 = arith.constant 0 : i32
    %c0_i32_0 = arith.constant 0 : i32
    %c0_i32_1 = arith.constant 0 : i32
    return %c0_i32, %c0_i32_0 : i32, i32
  }
}

</mosaic_0001>

<bundles_post_ra>
// kernel: tpu_custom_call.1
= control target key start
LH: loop header
LB: loop body
LE: loop exit
PB: predicated region body
PF: predicated region fallthrough
CT: control target
= control target key end

     0   :  { %8 = vsyncpa [#allocation6], 0  ;;  %s390_s0 = inlined_call_operand.hbm [shape: f32[8,128], index: 0, kind: input, shape index: {}]   ;;  %s391_s1 = inlined_call_operand.hbm [shape: f32[8,128], index: 1, kind: input, shape index: {}]   ;;  %s392_s2 = inlined_call_operand.hbm [shape: f32[8,128], index: 2, kind: input, shape index: {}]   ;;  %s393_s3 = inlined_call_operand.hbm [shape: f32[1,128], index: 3, kind: output, shape index: {}]  }
   0x1   :  { %9 = vsyncpa [#allocation9], 0  ;;  %s27_s14 = sshll.u32 %s391_s1, 4  ;;  %s28_s14 = int_to_ptr.hbm [resolvable:$true] %s27_s14 }
   0x2   :  { %10 = vsyncpa [#allocation7], 0  ;;  %s345_s15 = smov [#allocation8]   ;;  %s16_s19 = sshll.u32 %s390_s0, 4  ;;  %s17_s19 = int_to_ptr.hbm [resolvable:$true] %s16_s19 }
   0x3   :  { %s29_s16 = sshll.u32 %s345_s15, 4  ;;  %s346_s20 = smov [#allocation5]   ;;  %s30_s16 = int_to_ptr.vmem [resolvable:$true] %s29_s16 }
   0x4   :  { %32 = dma.hbm_to_vmem [thread:$0]  %s28_s14, 128, %s30_s16, [#allocation9]  }
   0x5   :  { %s18_s21 = sshll.u32 %s346_s20, 4  ;;  %s38_s24 = sshll.u32 %s392_s2, 4  ;;  %s19_s21 = int_to_ptr.vmem [resolvable:$true] %s18_s21  ;;  %s39_s24 = int_to_ptr.hbm [resolvable:$true] %s38_s24 }
   0x6   :  { %21 = dma.hbm_to_vmem [thread:$0]  %s17_s19, 128, %s19_s21, [#allocation6]  }
   0x7   :  { %s347_s1 = smov [#allocation10]  }
   0x8   :  { %s40_s25 = sshll.u32 %s347_s1, 4  ;;  %s41_s25 = int_to_ptr.vmem [resolvable:$true] %s40_s25 }
   0x9   :  { %43 = dma.hbm_to_vmem [thread:$0]  %s39_s24, 128, %s41_s25, [#allocation9]  }
   0xa   :  { %339 = dma.done.wait [#allocation6], 128  }
   0xb   :  { %340 = vsyncadd [#allocation6], 4294967168 }
   0xc   :  { %341 = dma.done.wait [#allocation9], 256  }
   0xd   :  { %342 = vsyncadd [#allocation9], 4294967040  ;;  %v104_v0 = vlaneseq  ;;  %v64_v4 = vld [vmem:[#allocation5] sm:$0xff]  ;;  %v65_v5 = vld [vmem:[#allocation8] sm:$0xff]  ;;  %s348_s0 = smov 126   ;;  %s349_s2 = smov 127  }
   0xe   :  { %74 = vrot.lane.b32.xlu0 %v64_v4, %s348_s0  ;;  %v66_v6 = vmin.f32 %v64_v4, %v65_v5  ;;  %v67_v7 = vmax.f32 %v64_v4, %v65_v5  ;;  %v350_v17 = vmov 0.0   ;;  %v351_v35 = vmov 0   ;;  %v63_v44 = vld [vmem:[#allocation10] sm:$0xff]  ;;  %s352_s27 = smov [#allocation11]   ;;  %s214_s4 = sshll.u32 %s393_s3, 4  ;;  %s215_s4 = int_to_ptr.hbm [resolvable:$true] %s214_s4 }
   0xf   :  { %v105_v1 = vand.u32 127, %v104_v0  ;;  %60 = vst [vmem:[#allocation2] sm:$0x1] %v350_v17  ;;  %v107_v25 = vshrl.u32 %v104_v0, 7  ;;  %vm170_vm11 = vcmask 1040384   ;;  %s212_s28 = sshll.u32 %s352_s27, 4  ;;  %s213_s28 = int_to_ptr.vmem [resolvable:$true] %s212_s28 }
  0x10   :  { %68 = vrot.lane.b32.xlu1 %v66_v6, %s348_s0  ;;  %61 = vst [vmem:[#allocation3] sm:$0x1] %v350_v17 }
  0x11   :  { %v382_v2 = vand.u32 3, %v105_v1  ;;  %62 = vst [vmem:[#allocation4] sm:$0x1] %v350_v17  ;;  %v111_v30 = vmul.u32 32, %v107_v25  ;;  %v112_v31 = vshra.s32 %v105_v1, 2 }
  0x13   :  { %v115_v3 = vcvt.s32.f32 %v382_v2  ;;  %v113_v34 = vadd.s32 %v112_v31, %v111_v30  ;;  %vm120_vm2 = vcmp.eq.s32.totalorder %v382_v2, 0  ;;  %vm126_vm3 = vcmp.eq.s32.totalorder %v382_v2, 3 }
  0x15   :  { %116 = vrot.lane.b32.xlu2 %v115_v3, %s348_s0  ;;  %vm133_vm6 = vcmp.lt.s32.totalorder %v113_v34, 256 }
  0x16   :  { %80 = vrot.lane.b32.xlu0 %v65_v5, %s348_s0 }
  0x18   :  { %86 = vrot.lane.b32.xlu1 %v67_v7, %s348_s0  ;;  %v156_v63 = vld [vmem:[#allocation4] sm:$0x1] }
  0x6f   :  { %v117_v16 = vpop.permute.xlu2 %116 }
  0x80   :  { %v75_v8 = vpop.permute.xlu0 %74 }
  0x81   :  { %v76_v9 = vadd.f32 %v75_v8, %v64_v4 }
  0x82   :  { %v69_v10 = vpop.permute.xlu1 %68 }
  0x83   :  { %v70_v11 = vadd.f32 %v69_v10, %v66_v6  ;;  %77 = vrot.lane.b32.xlu2 %v76_v9, %s349_s2  ;;  %v135_v6 = vld [vmem:[#allocation2] sm:$0x1] }
  0x85   :  { %71 = vrot.lane.b32.xlu1 %v70_v11, %s349_s2 }
  0x88   :  { %v81_v12 = vpop.permute.xlu0 %80 }
  0x89   :  { %v82_v13 = vadd.f32 %v81_v12, %v65_v5 }
  0x8a   :  { %v87_v14 = vpop.permute.xlu1 %86 }
  0x8b   :  { %v88_v15 = vadd.f32 %v87_v14, %v67_v7  ;;  %83 = vrot.lane.b32.xlu0 %v82_v13, %s349_s2 }
  0x8d   :  { %89 = vrot.lane.b32.xlu2 %v88_v15, %s349_s2 }
  0x93   :  { %118 = vrot.lane.b32.xlu0 %v117_v16, %s349_s2 }
  0xdd   :  { %v78_v18 = vpop.permute.xlu2 %77 }
  0xde   :  { %v79_v23 = vmul.f32 %v78_v18, %v76_v9  ;;  %v145_v9 = vld [vmem:[#allocation3] sm:$0x1] }
  0xe7   :  { %v90_v19 = vpop.permute.xlu2 %89 }
  0xe8   :  { %v91_v20 = vmul.f32 %v90_v19, %v88_v15 }
  0xea   :  { %v92_v28 = vadd.f32 1e-07, %v91_v20 }
  0xec   :  { %239 = vrcp.f32 %v92_v28 }
  0xf2   :  { %v240_v41 = vpop.eup %239 }
  0xf7   :  { %v72_v21 = vpop.permute.xlu1 %71 }
  0xf8   :  { %v73_v26 = vmul.f32 %v72_v21, %v70_v11 }
  0xfa   :  { %v95_v42 = vadd.f32 1.0, %v73_v26 }
  0xfd   :  { %v84_v22 = vpop.permute.xlu0 %83 }
  0xfe   :  { %v85_v24 = vmul.f32 %v84_v22, %v82_v13 }
 0x100   :  { %v93_v27 = vadd.f32 %v85_v24, %v79_v23 }
 0x102   :  { %v94_v29 = vsub.f32 %v93_v27, %v73_v26 }
 0x104   :  { %v96_v32 = vadd.f32 1.0, %v94_v29  ;;  %v99_v40 = vsub.f32 %v92_v28, %v94_v29 }
 0x105   :  { %v119_v33 = vpop.permute.xlu0 %118 }
 0x106   :  { %241 = vrcp.f32 %v96_v32  ;;  %vm121_vm0 = vcmp.eq.f32.partialorder %v119_v33, 3.0  ;;  %vm127_vm1 = vcmp.eq.f32.partialorder %v119_v33, 0.0  ;;  %v101_v46 = vmul.f32 %v240_v41, %v99_v40 }
 0x107   :  { %v122_v36 = vsel %vm121_vm0, 1, %v351_v35  ;;  %v128_v37 = vsel %vm127_vm1, 1, %v351_v35 }
 0x108   :  { %v123_v38 = vperm.slane %v122_v36, 0  ;;  %v129_v39 = vperm.slane %v128_v37, 0 }
 0x10a   :  { %vm124_vm4 = vcmp.eq.s32.totalorder %v123_v38, 1  ;;  %vm130_vm5 = vcmp.eq.s32.totalorder %v129_v39, 1 }
 0x10b   :  { %vm125_vm7 = vmand %vm120_vm2, %vm124_vm4 }
 0x10c   :  { %v242_v43 = vpop.eup %241  ;;  %vm131_vm8 = vmand %vm126_vm3, %vm130_vm5 }
 0x10d   :  { %v98_v45 = vmul.f32 %v242_v43, %v95_v42  ;;  %vm132_vm9 = vmor %vm125_vm7, %vm131_vm8 }
 0x10e   :  { %vm134_vm10 = vmand %vm132_vm9, %vm133_vm6 }
 0x10f   :  { %v102_v47 = vsub.f32 %v98_v45, %v101_v46  ;;  %v157_v48 = vsel %vm134_vm10, %v63_v44, 0.0 }
 0x110   :  { %v158_v49 = vrot.slane %v157_v48, 4 }
 0x111   :  { %v103_v50 = vsub.f32 1.0, %v102_v47 }
 0x112   :  { %v159_v51 = vadd.f32 %v158_v49, %v157_v48 }
 0x113   :  { %v136_v52 = vsel %vm134_vm10, %v103_v50, 0.0  ;;  %v146_v53 = vmul.f32 %v103_v50, %v63_v44 }
 0x114   :  { %v137_v54 = vrot.slane %v136_v52, 4  ;;  %v160_v55 = vrot.slane %v159_v51, 2 }
 0x115   :  { %v147_v56 = vsel %vm134_vm10, %v146_v53, 0.0 }
 0x116   :  { %v138_v57 = vadd.f32 %v137_v54, %v136_v52  ;;  %v148_v58 = vrot.slane %v147_v56, 4  ;;  %v161_v59 = vadd.f32 %v160_v55, %v159_v51 }
 0x118   :  { %v139_v60 = vrot.slane %v138_v57, 2  ;;  %v149_v61 = vadd.f32 %v148_v58, %v147_v56  ;;  %v162_v62 = vrot.slane %v161_v59, 1 }
 0x11a   :  { %v140_v0 = vadd.f32 %v139_v60, %v138_v57  ;;  %v150_v1 = vrot.slane %v149_v61, 2  ;;  %v163_v2 = vadd.f32 %v162_v62, %v161_v59 }
 0x11c   :  { %v141_v3 = vrot.slane %v140_v0, 1  ;;  %v151_v4 = vadd.f32 %v150_v1, %v149_v61  ;;  %v164_v5 = vadd.f32 %v163_v2, %v156_v63 }
 0x11e   :  { %v142_v7 = vadd.f32 %v141_v3, %v140_v0  ;;  %v152_v8 = vrot.slane %v151_v4, 1  ;;  %165 = vst [vmem:[#allocation4] sm:$0x1] %v164_v5 }
 0x120   :  { %v143_v10 = vadd.f32 %v142_v7, %v135_v6  ;;  %v153_v11 = vadd.f32 %v152_v8, %v151_v4 }
 0x122   :  { %144 = vst [vmem:[#allocation2] sm:$0x1] %v143_v10  ;;  %v154_v12 = vadd.f32 %v153_v11, %v145_v9 }
 0x124   :  { %155 = vst [vmem:[#allocation3] sm:$0x1] %v154_v12 }
 0x125   :  { %v169_v13 = vld [vmem:[#allocation4] sm:$0x1] }
 0x126   :  { %v171_v14 = vsel %vm170_vm11, %v169_v13, 0.0 }
 0x127   :  { %172 = vadd.xlane.f32.xlu1 %v171_v14 }
 0x129   :  { %v193_v15 = vld [vmem:[#allocation2] sm:$0x1] }
 0x12a   :  { %v194_v16 = vsel %vm170_vm11, %v193_v15, 0.0 }
 0x12b   :  { %195 = vadd.xlane.f32.xlu0 %v194_v16  ;;  %v182_v17 = vld [vmem:[#allocation3] sm:$0x1] }
 0x12c   :  { %v183_v18 = vsel %vm170_vm11, %v182_v17, 0.0 }
 0x12d   :  { %184 = vadd.xlane.f32.xlu2 %v183_v18 }
 0x19a   :  { %v173_v19 = vpop.xlane.xlu1 %172 }
 0x19b   :  { %v174_v20 = vrot.slane %v173_v19, 4 }
 0x19d   :  { %v175_v21 = vadd.f32 %v174_v20, %v173_v19 }
 0x19e   :  { %v196_v22 = vpop.xlane.xlu0 %195 }
 0x19f   :  { %v176_v23 = vrot.slane %v175_v21, 2  ;;  %v197_v24 = vrot.slane %v196_v22, 4 }
 0x1a0   :  { %v185_v25 = vpop.xlane.xlu2 %184 }
 0x1a1   :  { %v198_v26 = vadd.f32 %v197_v24, %v196_v22  ;;  %v186_v27 = vrot.slane %v185_v25, 4  ;;  %v177_v28 = vadd.f32 %v176_v23, %v175_v21 }
 0x1a3   :  { %v199_v29 = vrot.slane %v198_v26, 2  ;;  %v187_v30 = vadd.f32 %v186_v27, %v185_v25  ;;  %v178_v31 = vrot.slane %v177_v28, 1 }
 0x1a5   :  { %v200_v32 = vadd.f32 %v199_v29, %v198_v26  ;;  %v188_v33 = vrot.slane %v187_v30, 2  ;;  %v179_v34 = vadd.f32 %v178_v31, %v177_v28 }
 0x1a7   :  { %v189_v35 = vadd.f32 %v188_v33, %v187_v30  ;;  %225 = vpush %v179_v34  ;;  %v201_v36 = vrot.slane %v200_v32, 1 }
 0x1a9   :  { %v190_v37 = vrot.slane %v189_v35, 1  ;;  %v202_v39 = vadd.f32 %v201_v36, %v200_v32 }
 0x1ab   :  { %v191_v38 = vadd.f32 %v190_v37, %v189_v35 }
 0x1ad   :  { %227 = vpush %v191_v38 }
 0x1ae   :  { %229 = vpush %v202_v39 }
 0x1d8   :  { %s226_s26 = spop %225 }
 0x1d9   :  { %p181_p0 = scmp.gt.f32.partialorder %s226_s26, 0.0 }
 0x1de   :  { %s228_s5 = spop %227 }
 0x1df   :  { %s230_s6 = spop %229 }
 0x1e0   :  { %s395_s5 = smov (!%p181_p0, %s228_s5), %s230_s6 }
 0x1e1   :  { %v205_v40 = vstv %s395_s5 }
 0x1e2   :  { %206 = vst [vmem:[#allocation11] sm:$0x1] %v205_v40 }
 0x1e3   :  { %217 = dma.vmem_to_hbm [thread:$0]  %s213_s28, 16, %s215_s4, [#allocation7]  }
 0x1e4   :  { %343 = dma.done.wait [#allocation7], 16  }
 0x1e5   :  { %344 = vsyncadd [#allocation7], 4294967280 }
 0x1e6   :  { %222 = vsyncpa [#allocation6], 1 }
 0x1e7   :  { %223 = vsyncpa [#allocation9], 1 }
 0x1e8   :  { %224 = vsyncpa [#allocation7], 1 }

</bundles_post_ra>
